<compile_context>
chip_gen: v7x
topology: tpu7x:2x2x1
jax: 0.10.0
libtpu: 0.0.40
codegen_flags: <defaults>
</compile_context>

<pallas_src>
import math

import jax
import jax.numpy as jnp
from jax.experimental import pallas as pl
from jax.experimental.pallas import tpu as pltpu


def _round_up(x, m):
    return ((x + m - 1) // m) * m


def ddpg_critic_kernel(s_ref, a_ref, w1_ref, b1_ref, w2a_ref, w2b_ref, b2_ref,
                       w3_ref, b3_ref, o_ref):
    # Layer 1: Linear(48 -> 64) + ReLU          (TB, 48) @ (48, 64)
    h1 = jnp.dot(s_ref[...], w1_ref[...], preferred_element_type=jnp.float32)
    h1 = jnp.maximum(h1 + b1_ref[...], 0.0)

    # Layer 2: Linear(68 -> 64) + ReLU, with concat(h1, action) folded into
    # two matmuls: concat(h1, a) @ W2 == h1 @ W2[:64] + a @ W2[64:]
    h2 = (jnp.dot(h1, w2a_ref[...], preferred_element_type=jnp.float32)
          + jnp.dot(a_ref[...], w2b_ref[...], preferred_element_type=jnp.float32))
    h2 = jnp.maximum(h2 + b2_ref[...], 0.0)

    # Output layer: Linear(64 -> 1), no activation.  Done on the VPU/XLU
    # (elementwise multiply + lane reduction) instead of an N=1 MXU matmul.
    # w3_ref is the (1, 64) weight row; b3_ref is (1, 1).
    o_ref[...] = (jnp.sum(h2 * w3_ref[...], axis=-1, keepdims=True)
                  + b3_ref[...])


def ddpg_critic_forward(state, action, params, *, block_b=1024):
    """state: (B, 48) f32, action: (B, 4) f32 -> (B, 1) f32."""
    B, S = state.shape
    A = action.shape[1]
    w1, b1, w2a, w2b, b2, w3_row, b3 = params
    H0 = w1.shape[1]
    H1 = w2a.shape[1]

    # Batch tile: large for pipelining efficiency, clamped for tiny batches.
    tb = min(block_b, _round_up(max(B, 1), 8))
    grid = (pl.cdiv(B, tb),)

    def resident(shape):
        # Weights/biases: same block every grid step -> fetched once, stay in VMEM.
        return pl.BlockSpec(shape, lambda i: (0, 0))

    flops = 2 * B * (S * H0 + H0 * H1 + A * H1 + H1)
    bytes_accessed = 4 * (B * (S + A + 1)
                          + w1.size + b1.size + w2a.size + w2b.size
                          + b2.size + w3_row.size + b3.size)

    return pl.pallas_call(
        ddpg_critic_kernel,
        out_shape=jax.ShapeDtypeStruct((B, 1), jnp.float32),
        grid_spec=pltpu.PrefetchScalarGridSpec(
            num_scalar_prefetch=0,
            grid=grid,
            in_specs=[
                pl.BlockSpec((tb, S), lambda i: (i, 0)),   # state tile
                pl.BlockSpec((tb, A), lambda i: (i, 0)),   # action tile
                resident(w1.shape),
                resident(b1.shape),
                resident(w2a.shape),
                resident(w2b.shape),
                resident(b2.shape),
                resident(w3_row.shape),
                resident(b3.shape),
            ],
            out_specs=pl.BlockSpec((tb, 1), lambda i: (i, 0)),
        ),
        compiler_params=pltpu.CompilerParams(
            dimension_semantics=("parallel",)),
        cost_estimate=pl.CostEstimate(
            flops=flops, transcendentals=0, bytes_accessed=bytes_accessed),
    )(state, action, w1, b1, w2a, w2b, b2, w3_row, b3)


def init_params(key, state_size=24, action_size=2, num_agents=2,
                hidden_dims=(64, 64)):
    """Deterministic init mirroring DDPG_Critic.weigths_bias_initialization().

    Hidden weights are stored transposed relative to torch (in, out) so the
    kernel does x @ W directly; the output weight is kept as the torch (1, 64)
    row since the kernel uses a VPU reduction for it.
    """
    in_state = num_agents * state_size      # 48
    in_act = num_agents * action_size       # 4
    h0, h1 = hidden_dims

    k = jax.random.split(key, 6)

    # input layer: Linear(48 -> 64), std = 1/sqrt(48)
    std1 = 1.0 / math.sqrt(in_state)
    w1 = jax.random.uniform(k[0], (in_state, h0), jnp.float32, -std1, std1)
    # NOTE: original code does bias.uniform_(std, std) -> constant std
    b1 = jnp.full((1, h0), std1, jnp.float32)

    # hidden layer 0: Linear(64+4 -> 64), std = 1/sqrt(68)
    std2 = 1.0 / math.sqrt(h0 + in_act)
    w2 = jax.random.uniform(k[1], (h0 + in_act, h1), jnp.float32, -std2, std2)
    w2a = w2[:h0, :]      # multiplies h1
    w2b = w2[h0:, :]      # multiplies action
    b2 = jax.random.uniform(k[2], (1, h1), jnp.float32, -std2, std2)

    # output layer: Linear(64 -> 1), std = 0.003; stored as a (1, 64) row.
    std3 = 0.003
    w3_row = jax.random.uniform(k[3], (1, h1), jnp.float32, -std3, std3)
    b3 = jax.random.uniform(k[4], (1, 1), jnp.float32, -std3, std3)

    return (w1, b1, w2a, w2b, b2, w3_row, b3)


def reference_forward(state, action, params):
    """Pure-JAX reference of the PyTorch forward (with explicit concat)."""
    w1, b1, w2a, w2b, b2, w3_row, b3 = params
    hi = jax.lax.Precision.HIGHEST
    h1 = jax.nn.relu(jnp.dot(state, w1, precision=hi) + b1)
    xcat = jnp.concatenate([h1, action], axis=1)
    w2 = jnp.concatenate([w2a, w2b], axis=0)
    h2 = jax.nn.relu(jnp.dot(xcat, w2, precision=hi) + b2)
    return jnp.dot(h2, w3_row.T, precision=hi) + b3


if __name__ == "__main__":
    key = jax.random.PRNGKey(0)
    kp, ks, ka = jax.random.split(key, 3)

    state_size, action_size, num_agents = 24, 2, 2

    params = init_params(kp, state_size, action_size, num_agents, (64, 64))

    # Small shapes consistent with the module: batch=2.
    B = 2
    state = jax.random.normal(ks, (B, num_agents * state_size), jnp.float32)
    action = jax.random.normal(ka, (B, num_agents * action_size), jnp.float32)

    out = jax.block_until_ready(ddpg_critic_forward(state, action, params))
    ref = reference_forward(state, action, params)
    assert out.shape == (B, 1)
    assert jnp.allclose(out, ref, atol=1e-4, rtol=1e-3), (out, ref)

    # Larger batch exercising the multi-step grid + partial last tile.
    B2 = 1000
    ks2, ka2 = jax.random.split(jax.random.PRNGKey(1))
    state2 = jax.random.normal(ks2, (B2, num_agents * state_size), jnp.float32)
    action2 = jax.random.normal(ka2, (B2, num_agents * action_size), jnp.float32)
    out2 = jax.block_until_ready(
        ddpg_critic_forward(state2, action2, params, block_b=512))
    ref2 = reference_forward(state2, action2, params)
    assert out2.shape == (B2, 1)
    assert jnp.allclose(out2, ref2, atol=1e-4, rtol=1e-3), "large-batch mismatch"

    print("KERNEL_OK")
</pallas_src>

<mosaic_0001>
module attributes {stable_mosaic.version = 11 : i64} {
  func.func @ddpg_critic_kernel(%arg0: i32, %arg1: memref<8x48xf32, #tpu.memory_space<vmem>>, %arg2: memref<8x4xf32, #tpu.memory_space<vmem>>, %arg3: memref<48x64xf32, #tpu.memory_space<vmem>>, %arg4: memref<1x64xf32, #tpu.memory_space<vmem>>, %arg5: memref<64x64xf32, #tpu.memory_space<vmem>>, %arg6: memref<4x64xf32, #tpu.memory_space<vmem>>, %arg7: memref<1x64xf32, #tpu.memory_space<vmem>>, %arg8: memref<1x64xf32, #tpu.memory_space<vmem>>, %arg9: memref<1x1xf32, #tpu.memory_space<vmem>>, %arg10: memref<8x1xf32, #tpu.memory_space<vmem>>) attributes {dimension_semantics = [#tpu.dimension_semantics<parallel>], iteration_bounds = array<i64: 1>, scalar_prefetch = 0 : i64, scratch_operands = 0 : i64, tpu.core_type = #tpu.core_type<tc>, window_params = [{transform_indices = @transform_0, window_bounds = array<i64: 8, 48>}, {transform_indices = @transform_1, window_bounds = array<i64: 8, 4>}, {pipeline_mode = #tpu.pipeline_mode<synchronous>, transform_indices = @transform_2, window_bounds = array<i64: 48, 64>}, {pipeline_mode = #tpu.pipeline_mode<synchronous>, transform_indices = @transform_3, window_bounds = array<i64: 1, 64>}, {pipeline_mode = #tpu.pipeline_mode<synchronous>, transform_indices = @transform_4, window_bounds = array<i64: 64, 64>}, {pipeline_mode = #tpu.pipeline_mode<synchronous>, transform_indices = @transform_5, window_bounds = array<i64: 4, 64>}, {pipeline_mode = #tpu.pipeline_mode<synchronous>, transform_indices = @transform_6, window_bounds = array<i64: 1, 64>}, {pipeline_mode = #tpu.pipeline_mode<synchronous>, transform_indices = @transform_7, window_bounds = array<i64: 1, 64>}, {pipeline_mode = #tpu.pipeline_mode<synchronous>, transform_indices = @transform_8, window_bounds = array<i64: 1, 1>}, {transform_indices = @transform_9, window_bounds = array<i64: 8, 1>}]} {
    %c0 = arith.constant 0 : index
    %c0_0 = arith.constant 0 : index
    %0 = vector.load %arg1[%c0, %c0_0] : memref<8x48xf32, #tpu.memory_space<vmem>>, vector<8x48xf32>
    %c0_1 = arith.constant 0 : index
    %c0_2 = arith.constant 0 : index
    %1 = vector.load %arg3[%c0_1, %c0_2] : memref<48x64xf32, #tpu.memory_space<vmem>>, vector<48x64xf32>
    %cst = arith.constant dense<0.000000e+00> : vector<8x64xf32>
    %2 = tpu.matmul %0, %1, %cst {dimension_numbers = #tpu.dot_dimension_numbers<[1], [0], [0], [1], [0, 0, 1, 1], [], []>} : vector<8x48xf32>, vector<48x64xf32>, vector<8x64xf32> -> vector<8x64xf32>
    %c0_3 = arith.constant 0 : index
    %c0_4 = arith.constant 0 : index
    %3 = vector.load %arg4[%c0_3, %c0_4] : memref<1x64xf32, #tpu.memory_space<vmem>>, vector<1x64xf32>
    %4 = vector.broadcast %3 : vector<1x64xf32> to vector<8x64xf32>
    %5 = arith.addf %2, %4 : vector<8x64xf32>
    %cst_5 = arith.constant 0.000000e+00 : f32
    %6 = vector.broadcast %cst_5 : f32 to vector<8x64xf32>
    %7 = arith.maximumf %5, %6 : vector<8x64xf32>
    %c0_6 = arith.constant 0 : index
    %c0_7 = arith.constant 0 : index
    %8 = vector.load %arg5[%c0_6, %c0_7] : memref<64x64xf32, #tpu.memory_space<vmem>>, vector<64x64xf32>
    %cst_8 = arith.constant dense<0.000000e+00> : vector<8x64xf32>
    %9 = tpu.matmul %7, %8, %cst_8 {dimension_numbers = #tpu.dot_dimension_numbers<[1], [0], [0], [1], [0, 0, 1, 1], [], []>} : vector<8x64xf32>, vector<64x64xf32>, vector<8x64xf32> -> vector<8x64xf32>
    %c0_9 = arith.constant 0 : index
    %c0_10 = arith.constant 0 : index
    %10 = vector.load %arg2[%c0_9, %c0_10] : memref<8x4xf32, #tpu.memory_space<vmem>>, vector<8x4xf32>
    %c0_11 = arith.constant 0 : index
    %c0_12 = arith.constant 0 : index
    %11 = vector.load %arg6[%c0_11, %c0_12] : memref<4x64xf32, #tpu.memory_space<vmem>>, vector<4x64xf32>
    %cst_13 = arith.constant dense<0.000000e+00> : vector<8x64xf32>
    %12 = tpu.matmul %10, %11, %cst_13 {dimension_numbers = #tpu.dot_dimension_numbers<[1], [0], [0], [1], [0, 0, 1, 1], [], []>} : vector<8x4xf32>, vector<4x64xf32>, vector<8x64xf32> -> vector<8x64xf32>
    %13 = arith.addf %9, %12 : vector<8x64xf32>
    %c0_14 = arith.constant 0 : index
    %c0_15 = arith.constant 0 : index
    %14 = vector.load %arg7[%c0_14, %c0_15] : memref<1x64xf32, #tpu.memory_space<vmem>>, vector<1x64xf32>
    %15 = vector.broadcast %14 : vector<1x64xf32> to vector<8x64xf32>
    %16 = arith.addf %13, %15 : vector<8x64xf32>
    %cst_16 = arith.constant 0.000000e+00 : f32
    %17 = vector.broadcast %cst_16 : f32 to vector<8x64xf32>
    %18 = arith.maximumf %16, %17 : vector<8x64xf32>
    %c0_17 = arith.constant 0 : index
    %c0_18 = arith.constant 0 : index
    %19 = vector.load %arg8[%c0_17, %c0_18] : memref<1x64xf32, #tpu.memory_space<vmem>>, vector<1x64xf32>
    %20 = vector.broadcast %19 : vector<1x64xf32> to vector<8x64xf32>
    %21 = arith.mulf %18, %20 : vector<8x64xf32>
    %cst_19 = arith.constant dense<0.000000e+00> : vector<8xf32>
    %22 = vector.multi_reduction <add>, %21, %cst_19 [1] : vector<8x64xf32> to vector<8xf32>
    %23 = vector.shape_cast %22 : vector<8xf32> to vector<8x1xf32>
    %c0_20 = arith.constant 0 : index
    %c0_21 = arith.constant 0 : index
    %24 = vector.load %arg9[%c0_20, %c0_21] : memref<1x1xf32, #tpu.memory_space<vmem>>, vector<1x1xf32>
    %25 = vector.broadcast %24 : vector<1x1xf32> to vector<8x1xf32>
    %26 = arith.addf %23, %25 : vector<8x1xf32>
    %c0_22 = arith.constant 0 : index
    %c0_23 = arith.constant 0 : index
    %27 = vector.load %arg10[%c0_22, %c0_23] : memref<8x1xf32, #tpu.memory_space<vmem>>, vector<8x1xf32>
    tpu.vector_store %arg10[%c0_22, %c0_23], %26 {strides = array<i32>} : memref<8x1xf32, #tpu.memory_space<vmem>>, vector<8x1xf32>,
    return
  }
  func.func @transform_0(%arg0: i32) -> (i32, i32) {
    %c0_i32 = arith.constant 0 : i32
    %c0_i32_0 = arith.constant 0 : i32
    return %arg0, %c0_i32 : i32, i32
  }
  func.func @transform_1(%arg0: i32) -> (i32, i32) {
    %c0_i32 = arith.constant 0 : i32
    %c0_i32_0 = arith.constant 0 : i32
    return %arg0, %c0_i32 : i32, i32
  }
  func.func @transform_2(%arg0: i32) -> (i32, i32) {
    %c0_i32 = arith.constant 0 : i32
    %c0_i32_0 = arith.constant 0 : i32
    %c0_i32_1 = arith.constant 0 : i32
    return %c0_i32, %c0_i32_0 : i32, i32
  }
  func.func @transform_3(%arg0: i32) -> (i32, i32) {
    %c0_i32 = arith.constant 0 : i32
    %c0_i32_0 = arith.constant 0 : i32
    %c0_i32_1 = arith.constant 0 : i32
    return %c0_i32, %c0_i32_0 : i32, i32
  }
  func.func @transform_4(%arg0: i32) -> (i32, i32) {
    %c0_i32 = arith.constant 0 : i32
    %c0_i32_0 = arith.constant 0 : i32
    %c0_i32_1 = arith.constant 0 : i32
    return %c0_i32, %c0_i32_0 : i32, i32
  }
  func.func @transform_5(%arg0: i32) -> (i32, i32) {
    %c0_i32 = arith.constant 0 : i32
    %c0_i32_0 = arith.constant 0 : i32
    %c0_i32_1 = arith.constant 0 : i32
    return %c0_i32, %c0_i32_0 : i32, i32
  }
  func.func @transform_6(%arg0: i32) -> (i32, i32) {
    %c0_i32 = arith.constant 0 : i32
    %c0_i32_0 = arith.constant 0 : i32
    %c0_i32_1 = arith.constant 0 : i32
    return %c0_i32, %c0_i32_0 : i32, i32
  }
  func.func @transform_7(%arg0: i32) -> (i32, i32) {
    %c0_i32 = arith.constant 0 : i32
    %c0_i32_0 = arith.constant 0 : i32
    %c0_i32_1 = arith.constant 0 : i32
    return %c0_i32, %c0_i32_0 : i32, i32
  }
  func.func @transform_8(%arg0: i32) -> (i32, i32) {
    %c0_i32 = arith.constant 0 : i32
    %c0_i32_0 = arith.constant 0 : i32
    %c0_i32_1 = arith.constant 0 : i32
    return %c0_i32, %c0_i32_0 : i32, i32
  }
  func.func @transform_9(%arg0: i32) -> (i32, i32) {
    %c0_i32 = arith.constant 0 : i32
    %c0_i32_0 = arith.constant 0 : i32
    return %arg0, %c0_i32 : i32, i32
  }
}

</mosaic_0001>

<bundles_post_ra>
// kernel: tpu_custom_call.1
= control target key start
LH: loop header
LB: loop body
LE: loop exit
PB: predicated region body
PF: predicated region fallthrough
CT: control target
= control target key end

     0   :  { %s689_s0 = inlined_call_operand.vmem [shape: f32[2,48], index: 0, kind: input, shape index: {}]   ;;  %s690_s1 = inlined_call_operand.hbm [shape: f32[2,4], index: 1, kind: input, shape index: {}]   ;;  %s691_s2 = inlined_call_operand.hbm [shape: f32[48,64], index: 2, kind: input, shape index: {}]   ;;  %s692_s3 = inlined_call_operand.vmem [shape: f32[1,64], index: 3, kind: input, shape index: {}]   ;;  %s693_s4 = inlined_call_operand.hbm [shape: f32[64,64], index: 4, kind: input, shape index: {}]   ;;  %s694_s5 = inlined_call_operand.vmem [shape: f32[4,64], index: 5, kind: input, shape index: {}]   ;;  %s695_s6 = inlined_call_operand.vmem [shape: f32[1,64], index: 6, kind: input, shape index: {}]   ;;  %s696_s7 = inlined_call_operand.vmem [shape: f32[1,64], index: 7, kind: input, shape index: {}]   ;;  %s697_s8 = inlined_call_operand.<no memory space> [shape: f32[1,1], index: 8, kind: input, shape index: {}]   ;;  %s698_s9 = inlined_call_operand.vmem [shape: f32[2,1], index: 9, kind: output, shape index: {}]  }
   0x1   :  { %v14_v0 = vstv %s697_s8 }
   0x2   :  { %15 = vst [vmem:[#allocation2] sm:$0x1] %v14_v0 }
   0x3   :  { %16 = vsyncpa [#allocation4], 0 }
   0x4   :  { %17 = vsyncpa [#allocation6], 0 }
   0x5   :  { %24 = vsyncadd [#allocation4], 96  ;;  %s563_s11 = smov [#allocation5]   ;;  %s493_s15 = scalar_lea.hbm %s691_s2, 768 }
   0x6   :  { %s37_s12 = sshll.u32 %s563_s11, 4  ;;  %p494_p0 = scmp.ne.s32.totalorder %s691_s2, %s493_s15  ;;  %s38_s12 = int_to_ptr.vmem [resolvable:$true] %s37_s12 }
   0x7   :  { %p497_p1 = scmp.lt.u32.totalorder %s493_s15, %s691_s2 }
   0x9   :  { %p499_p2 = pnand %p497_p1, %p494_p0 }
   0xb   :  { %502 = shalt.err (!%p499_p2)
}
   0xc   :  { %s503_s8 = scalar_lea.vmem %s38_s12, 768  ;;  %p508_p4 = scmp.lt.s32.totalorder %s38_s12, %s38_s12 }
   0xd   :  { %p504_p3 = scmp.ne.s32.totalorder %s38_s12, %s503_s8  ;;  %p509_p5 = scmp.lt.s32.totalorder %s503_s8, %s503_s8 }
   0xf   :  { %p510_p6 = por %p509_p5, %p508_p4 }
  0x11   :  { %p511_p7 = pnand %p510_p6, %p504_p3 }
  0x13   :  { %514 = shalt.err (!%p511_p7)
}
  0x14   :  { %s564_s20 = smov 128   ;;  %s565_s21 = smov 8  }
  0x15   :  { %43 = dma.hbm_to_vmem [thread:$0]  %s691_s2, 768, %s38_s12, [#allocation6], %s564_s20, %s564_s20, %s565_s21  }
  0x16   :  { %s566_s24 = smov [#allocation3]   ;;  %s515_s28 = scalar_lea.hbm %s690_s1, 32 }
  0x17   :  { %s25_s25 = sshll.u32 %s566_s24, 4  ;;  %p516_p8 = scmp.ne.s32.totalorder %s690_s1, %s515_s28  ;;  %s26_s25 = int_to_ptr.vmem [resolvable:$true] %s25_s25 }
  0x18   :  { %p519_p9 = scmp.lt.u32.totalorder %s515_s28, %s690_s1 }
  0x1a   :  { %p521_p10 = pnand %p519_p9, %p516_p8 }
  0x1c   :  { %524 = shalt.err (!%p521_p10)
}
  0x1d   :  { %s525_s13 = scalar_lea.vmem %s26_s25, 32  ;;  %s529_s2 = scalar_lea.vmem %s26_s25, 128 }
  0x1e   :  { %p526_p11 = scmp.ne.s32.totalorder %s26_s25, %s525_s13  ;;  %p530_p12 = scmp.lt.s32.totalorder %s26_s25, %s26_s25 }
  0x1f   :  { %p531_p13 = scmp.lt.s32.totalorder %s529_s2, %s525_s13 }
  0x21   :  { %p532_p0 = por %p531_p13, %p530_p12 }
  0x23   :  { %p533_p1 = pnand %p532_p0, %p526_p11 }
  0x25   :  { %536 = shalt.err (!%p533_p1)
}
  0x26   :  { %s567_s12 = smov 32   ;;  %s568_s14 = smov 2  }
  0x27   :  { %31 = dma.hbm_to_vmem [thread:$0]  %s690_s1, 32, %s26_s25, [#allocation4], %s567_s12, %s567_s12, %s568_s14  }
  0x28   :  { %s569_s17 = smov [#allocation7]   ;;  %s537_s22 = scalar_lea.hbm %s693_s4, 1024 }
  0x29   :  { %s51_s18 = sshll.u32 %s569_s17, 4  ;;  %p538_p2 = scmp.ne.s32.totalorder %s693_s4, %s537_s22  ;;  %s52_s18 = int_to_ptr.vmem [resolvable:$true] %s51_s18 }
  0x2a   :  { %p541_p3 = scmp.lt.u32.totalorder %s537_s22, %s693_s4 }
  0x2c   :  { %p543_p4 = pnand %p541_p3, %p538_p2 }
  0x2e   :  { %546 = shalt.err (!%p543_p4)
}
  0x2f   :  { %s547_s28 = scalar_lea.vmem %s52_s18, 1024  ;;  %p552_p6 = scmp.lt.s32.totalorder %s52_s18, %s52_s18 }
  0x30   :  { %p548_p5 = scmp.ne.s32.totalorder %s52_s18, %s547_s28  ;;  %p553_p7 = scmp.lt.s32.totalorder %s547_s28, %s547_s28 }
  0x32   :  { %p554_p8 = por %p553_p7, %p552_p6 }
  0x34   :  { %p555_p9 = pnand %p554_p8, %p548_p5 }
  0x36   :  { %558 = shalt.err (!%p555_p9)
}
  0x37   :  { %57 = dma.hbm_to_vmem [thread:$0]  %s693_s4, 1024, %s52_s18, [#allocation6], %s564_s20, %s564_s20, %s565_s21  }
  0x38   :  { %559 = dma.done.wait [#allocation4], 128  }
  0x39   :  { %560 = vsyncadd [#allocation4], 4294967168 }
  0x3a   :  { %561 = dma.done.wait [#allocation6], 1792  }
  0x3b   :  { %562 = vsyncadd [#allocation6], 4294965504  ;;  %v570_v1 = vmov 0.0|0.0   ;;  %vm571_vm0 = vmmov 0   ;;  %v572_v2 = vmov 0.0   ;;  %v76_v3 = vld [vmem:[#allocation5] sm:$0xff] }
  0x3c   :  { %462 = vmatprep.subr.bf16.mxu0 %v570_v1  ;;  %435 = vmatprep.mubr.msk.f32.mxu0 %vm571_vm0, %v572_v2  ;;  %v77_v4 = vld [vmem:[#allocation5 + $0x8] sm:$0xff]  ;;  %v78_v5 = vld [vmem:[#allocation5 + $0x10] sm:$0xff]  ;;  %v79_v7 = vld [vmem:[#allocation5 + $0x18] sm:$0xff]  ;;  %vm89_vm1 = vcmask 392192   ;;  %vm178_vm2 = vcmask 1043456   ;;  %vm174_vm3 = vcmask 31744  }
  0x3d   :  { %471 = vmatprep.subr.bf16.mxu1 %v570_v1  ;;  %459 = vmatprep.mubr.msk.f32.mxu1 %vm571_vm0, %v572_v2  ;;  %v463_v6 = vpack.c.bf16 %v77_v4, %v76_v3  ;;  %v164_v8 = vld [vmem:[#allocation7] sm:$0xff]  ;;  %v165_v9 = vld [vmem:[#allocation7 + $0x8] sm:$0xff]  ;;  %v466_v10 = vpack.c.bf16 %v79_v7, %v78_v5  ;;  %v166_v12 = vld [vmem:[#allocation7 + $0x10] sm:$0xff]  ;;  %vm252_vm4 = vcmask 523264   ;;  %vm354_vm5 = vcmask 7168  }
  0x3e   :  { %v472_v11 = vpack.c.bf16 %v165_v9, %v164_v8  ;;  %v167_v13 = vld [vmem:[#allocation7 + $0x18] sm:$0xff]  ;;  %v80_v14 = vld [vmem:[#allocation5 + $0x20] sm:$0xff]  ;;  %v168_v17 = vld [vmem:[#allocation7 + $0x20] sm:$0xff] }
  0x3f   :  { %464 = vmatpush3.bf16.msra.mxu0 %v463_v6  ;;  %v81_v15 = vld [vmem:[#allocation5 + $0x28] sm:$0xff]  ;;  %v475_v16 = vpack.c.bf16 %v167_v13, %v166_v12  ;;  %v169_v18 = vld [vmem:[#allocation7 + $0x28] sm:$0xff]  ;;  %v170_v22 = vld [vmem:[#allocation7 + $0x30] sm:$0xff] }
  0x40   :  { %465 = vmatprep.subr.bf16.mxu0 %v570_v1  ;;  %473 = vmatpush3.bf16.msra.mxu1 %v472_v11  ;;  %v469_v19 = vpack.c.bf16 %v81_v15, %v80_v14  ;;  %v478_v20 = vpack.c.bf16 %v169_v18, %v168_v17  ;;  %v75_v21 = vld [vmem:[%s689_s0] sm:$0xff]  ;;  %v171_v23 = vld [vmem:[#allocation7 + $0x38] sm:$0xff] }
  0x41   :  { %474 = vmatprep.subr.bf16.mxu1 %v570_v1  ;;  %v481_v24 = vpack.c.bf16 %v171_v23, %v170_v22  ;;  %v173_v25 = vld [vmem:[%s694_s5] sm:$0xf] }
  0x42   :  { %v172_v26 = vld [vmem:[#allocation3] sm:$0xff]  ;;  %v397_v27 = vld [vmem:[%s692_s3] ss:$0 sm:$0xff] }
  0x43   :  { %467 = vmatpush3.bf16.msra.mxu0 %v466_v10  ;;  %v402_v35 = vld [vmem:[%s695_s6] ss:$0 sm:$0xff] }
  0x44   :  { %468 = vmatprep.subr.bf16.mxu0 %v570_v1  ;;  %476 = vmatpush3.bf16.msra.mxu1 %v475_v16  ;;  %v403_v39 = vld [vmem:[%s696_s7] ss:$0 sm:$0xff] }
  0x45   :  { %477 = vmatprep.subr.bf16.mxu1 %v570_v1  ;;  %v404_v43 = vld [vmem:[#allocation2] ss:$0 sm:$0xff] }
  0x47   :  { %470 = vmatpush3.bf16.msra.mxu0 %v469_v19 }
  0x48   :  { %438 = vmatprep.subr.mxu0 %v572_v2  ;;  %479 = vmatpush3.bf16.msra.mxu1 %v478_v20 }
  0x49   :  { %480 = vmatprep.subr.bf16.mxu1 %v570_v1 }
  0x4a   :  { %436 = vmatmul.mubr.msk.f32.vlgmr.msra.gmra.mrb[0].mxu0 %vm89_vm1, %v75_v21 }
  0x4b   :  { %440 = vmatprep.mubr.msk.f32.mxu0 %vm571_vm0, %v572_v2  ;;  %439 = vmatpush3.msk.msra.mxu0 %vm178_vm2, %v173_v25 }
  0x4c   :  { %482 = vmatpush3.bf16.msra.mxu1 %v481_v24 }
  0x4e   :  { %441 = vmatmul.mubr.msk.f32.vlgmr.msra.gmra.mrb[2].mxu0 %vm174_vm3, %v172_v26 }
 0x11d   :  { %v159_v28 = vpop.f32.mrb[0].mxu0 }
 0x11e   :  { %v160_v29 = vadd.f32 %v397_v27, %v159_v28  ;;  %v437_v30 = vpop.f32.mrb[1].mxu0 }
 0x120   :  { %v163_v31 = vmax.f32 %v160_v29, 0.0 }
 0x121   :  { %v248_v32 = vpop.f32.mrb[2].mxu0 }
 0x122   :  { %460 = vmatmul.mubr.msk.f32.vlgmr.msra.gmra.mrb[0].mxu1 %vm252_vm4, %v163_v31  ;;  %v442_v33 = vpop.f32.mrb[3].mxu0 }
 0x1f5   :  { %v322_v34 = vpop.f32.mrb[0].mxu1 }
 0x1f6   :  { %v323_v36 = vadd.f32 %v322_v34, %v248_v32  ;;  %v461_v37 = vpop.f32.mrb[1].mxu1 }
 0x1f8   :  { %v333_v38 = vadd.f32 %v402_v35, %v323_v36 }
 0x1fa   :  { %v334_v40 = vmax.f32 %v333_v38, 0.0 }
 0x1fc   :  { %v342_v41 = vmul.f32 %v403_v39, %v334_v40 }
 0x1fe   :  { %v343_v42 = vsel %vm252_vm4, %v342_v41, 0.0 }
 0x1ff   :  { %344 = vadd.xlane.f32.xlu0 %v343_v42 }
 0x28c   :  { %v345_v44 = vpop.xlane.xlu0 %344 }
 0x28d   :  { %v353_v45 = vadd.f32 %v404_v43, %v345_v44 }
 0x28f   :  { %355 = vst.msk [vmem:[#allocation8] sm:$0xff] %vm354_vm5, %v353_v45 }
 0x296   :  { %v373_v46 = vld [vmem:[#allocation8] sm:$0x3] }
 0x297   :  { %374 = vst [vmem:[%s698_s9] sm:$0x3] %v373_v46 }
 0x298   :  { %391 = vsyncpa [#allocation4], 1 }
 0x299   :  { %392 = vsyncpa [#allocation6], 1 }

</bundles_post_ra>
